<compile_context>
chip_gen: v5e
topology: v5e:2x2
jax: 0.10.0
libtpu: 0.0.40
codegen_flags: <defaults>
</compile_context>

<pallas_src>
from functools import partial

import jax
import jax.numpy as jnp
from jax.experimental import pallas as pl
from jax.experimental.pallas import tpu as pltpu


def _round_up(a, b):
    return ((a + b - 1) // b) * b


def _choose_row_tile(R, CW_pad, C_pad):
    """Row tile: double-buffered bf16 x tile + double-buffered f32 y tile
    must fit well inside the 32 MiB scoped-VMEM default (portable v5e/v6e/v7x)."""
    budget = 20 * 1024 * 1024
    per_row = 2 * (CW_pad * 2) + 2 * (C_pad * 4)   # x (bf16) + y (f32), 2 buffers each
    tr = budget // per_row
    tr = int(max(16, min(512, tr)))
    tr -= tr % 16                                   # bf16 sublane packing
    tr = min(tr, _round_up(R, 16))
    return max(16, tr)


# ---------------------------------------------------------------------------
# Pass 1: conv matmul (bf16 MXU, f32 accumulate) + per-tile BN partial stats.
# ---------------------------------------------------------------------------
def conv_stats_kernel(x_ref, w_ref, y_ref, stats_ref):
    # x_ref:     (TR, CW_pad)   bf16 im2col rows
    # w_ref:     (CW_pad, C_pad) bf16 flattened conv weight (grid-invariant)
    # y_ref:     (TR, C_pad)    f32 conv output tile (no bias: BN cancels it)
    # stats_ref: (1, 2, C_pad)  f32 [sum(y), sum(y*y)] for this tile
    y = jnp.dot(x_ref[...], w_ref[...], preferred_element_type=jnp.float32)
    y_ref[...] = y
    stats_ref[0, 0:1, :] = jnp.sum(y, axis=0, keepdims=True)
    stats_ref[0, 1:2, :] = jnp.sum(y * y, axis=0, keepdims=True)


# ---------------------------------------------------------------------------
# Pass 2: folded BN affine (y*scale + shift) + ELU.
# ---------------------------------------------------------------------------
def bn_elu_kernel(y_ref, scale_ref, shift_ref, o_ref):
    z = y_ref[...] * scale_ref[...] + shift_ref[...]
    # ELU(alpha=1); clamp the exp argument so the unselected branch never overflows.
    o_ref[...] = jnp.where(z > 0.0, z,
                           jnp.exp(jnp.minimum(z, 0.0)) - 1.0).astype(o_ref.dtype)


@partial(jax.jit, static_argnames=("window_size",))
def conv_layer_forward(x, weight, bias, gamma, beta, window_size):
    """x: (N, C, L) float32. Returns (N, C, L // window_size) float32.

    `bias` is accepted for interface parity but intentionally unused: under
    training-mode BatchNorm the conv bias is exactly cancelled by the mean
    subtraction, so adding it is wasted work.
    """
    del bias
    N, C, L = x.shape
    W = window_size
    Lout = L // W
    assert Lout >= 1
    R = N * Lout
    CW = C * W

    C_pad = _round_up(C, 128)
    CW_pad = _round_up(CW, 128)
    TR = _choose_row_tile(R, CW_pad, C_pad)
    R_pad = _round_up(R, TR)
    num_tiles = R_pad // TR

    # --- im2col glue (XLA), emitted directly in bf16; [ci, k] column order
    # matches the flattened PyTorch weight (C_out, C_in, W) -> (C_out, C_in*W).
    x_cols = x[:, :, : Lout * W].reshape(N, C, Lout, W)
    x_cols = jnp.transpose(x_cols, (0, 2, 1, 3)).reshape(R, CW).astype(jnp.bfloat16)
    x_cols = jnp.pad(x_cols, ((0, R_pad - R), (0, CW_pad - CW)))

    w2 = weight.reshape(C, CW).T.astype(jnp.bfloat16)        # (CW, C)
    w2 = jnp.pad(w2, ((0, CW_pad - CW), (0, C_pad - C)))

    gamma_p = jnp.pad(gamma.astype(jnp.float32), (0, C_pad - C))
    beta_p = jnp.pad(beta.astype(jnp.float32), (0, C_pad - C))

    # --- Pass 1: conv matmul + per-tile partial stats (fully parallel grid).
    y_full, partials = pl.pallas_call(
        conv_stats_kernel,
        out_shape=(
            jax.ShapeDtypeStruct((R_pad, C_pad), jnp.float32),
            jax.ShapeDtypeStruct((num_tiles, 2, C_pad), jnp.float32),
        ),
        grid=(num_tiles,),
        in_specs=[
            pl.BlockSpec((TR, CW_pad), lambda i: (i, 0)),
            pl.BlockSpec((CW_pad, C_pad), lambda i: (0, 0)),   # resident weight
        ],
        out_specs=(
            pl.BlockSpec((TR, C_pad), lambda i: (i, 0)),
            pl.BlockSpec((1, 2, C_pad), lambda i: (i, 0, 0)),
        ),
        compiler_params=pltpu.CompilerParams(
            dimension_semantics=("parallel",)),
        cost_estimate=pl.CostEstimate(
            flops=2 * R_pad * CW_pad * C_pad,
            transcendentals=0,
            bytes_accessed=(R_pad * CW_pad * 2 + CW_pad * C_pad * 2
                            + R_pad * C_pad * 4 + num_tiles * 2 * C_pad * 4)),
    )(x_cols, w2)

    # --- Tiny finalize (O(C), plain JAX): batch mean/var over the true R rows
    # (zero-padded rows contribute exactly 0 to both sums), folded BN affine.
    sums = jnp.sum(partials, axis=0)                  # (2, C_pad)
    mean = sums[0] / R
    var = jnp.maximum(sums[1] / R - mean * mean, 0.0)  # biased var, training-mode BN
    inv = jax.lax.rsqrt(var + 1e-5)                    # PyTorch default eps
    scale = (gamma_p * inv).reshape(1, C_pad)
    shift = (beta_p - mean * gamma_p * inv).reshape(1, C_pad)

    # --- Pass 2: normalize + ELU (fully parallel grid).
    out_rows = pl.pallas_call(
        bn_elu_kernel,
        out_shape=jax.ShapeDtypeStruct((R_pad, C_pad), jnp.float32),
        grid=(num_tiles,),
        in_specs=[
            pl.BlockSpec((TR, C_pad), lambda i: (i, 0)),
            pl.BlockSpec((1, C_pad), lambda i: (0, 0)),        # resident scale
            pl.BlockSpec((1, C_pad), lambda i: (0, 0)),        # resident shift
        ],
        out_specs=pl.BlockSpec((TR, C_pad), lambda i: (i, 0)),
        compiler_params=pltpu.CompilerParams(
            dimension_semantics=("parallel",)),
        cost_estimate=pl.CostEstimate(
            flops=3 * R_pad * C_pad,
            transcendentals=R_pad * C_pad,
            bytes_accessed=2 * R_pad * C_pad * 4),
    )(y_full, scale, shift)

    # (R_pad, C_pad) -> (N, C, Lout). Output transpose kept as XLA glue (it is
    # W-times smaller than x).
    out = out_rows[:R, :C].reshape(N, Lout, C)
    return jnp.transpose(out, (0, 2, 1))

    # TODO(synk): BatchNorm1d running_mean/running_var tracking (a training
    # side-effect, not part of the forward output) is not emulated.


if __name__ == "__main__":
    # Small deterministic setup consistent with the module.
    N, C, L, WINDOW = 2, 8, 32, 4

    key = jax.random.PRNGKey(0)
    kx, kw, kb = jax.random.split(key, 3)

    x = jax.random.normal(kx, (N, C, L), dtype=jnp.float32)

    # Conv1d parameters: weight (C_out=C, C_in=C, W), bias (C,).
    bound = float(1.0 / (C * WINDOW) ** 0.5)
    weight = jax.random.uniform(kw, (C, C, WINDOW), jnp.float32, -bound, bound)
    bias = jax.random.uniform(kb, (C,), jnp.float32, -bound, bound)

    # BatchNorm1d default init: gamma=1, beta=0.
    gamma = jnp.ones((C,), dtype=jnp.float32)
    beta = jnp.zeros((C,), dtype=jnp.float32)

    out = conv_layer_forward(x, weight, bias, gamma, beta, WINDOW)
    jax.block_until_ready(out)

    assert out.shape == (N, C, L // WINDOW), out.shape
    print("KERNEL_OK")
</pallas_src>

<mosaic_0001>
module attributes {stable_mosaic.version = 11 : i64} {
  func.func @conv_stats_kernel(%arg0: i32, %arg1: memref<16x128xbf16, #tpu.memory_space<vmem>>, %arg2: memref<128x128xbf16, #tpu.memory_space<vmem>>, %arg3: memref<16x128xf32, #tpu.memory_space<vmem>>, %arg4: memref<1x2x128xf32, #tpu.memory_space<vmem>>) attributes {dimension_semantics = [#tpu.dimension_semantics<parallel>], iteration_bounds = array<i64: 1>, scalar_prefetch = 0 : i64, scratch_operands = 0 : i64, tpu.core_type = #tpu.core_type<tc>, window_params = [{transform_indices = @transform_0, window_bounds = array<i64: 16, 128>}, {pipeline_mode = #tpu.pipeline_mode<synchronous>, transform_indices = @transform_1, window_bounds = array<i64: 128, 128>}, {transform_indices = @transform_2, window_bounds = array<i64: 16, 128>}, {transform_indices = @transform_3, window_bounds = array<i64: 1, 2, 128>}]} {
    %c0 = arith.constant 0 : index
    %c0_0 = arith.constant 0 : index
    %0 = vector.load %arg1[%c0, %c0_0] : memref<16x128xbf16, #tpu.memory_space<vmem>>, vector<16x128xbf16>
    %c0_1 = arith.constant 0 : index
    %c0_2 = arith.constant 0 : index
    %1 = vector.load %arg2[%c0_1, %c0_2] : memref<128x128xbf16, #tpu.memory_space<vmem>>, vector<128x128xbf16>
    %cst = arith.constant dense<0.000000e+00> : vector<16x128xf32>
    %2 = tpu.matmul %0, %1, %cst {dimension_numbers = #tpu.dot_dimension_numbers<[1], [0], [0], [1], [0, 0, 1, 1], [], []>} : vector<16x128xbf16>, vector<128x128xbf16>, vector<16x128xf32> -> vector<16x128xf32>
    %c0_3 = arith.constant 0 : index
    %c0_4 = arith.constant 0 : index
    %3 = vector.load %arg3[%c0_3, %c0_4] : memref<16x128xf32, #tpu.memory_space<vmem>>, vector<16x128xf32>
    tpu.vector_store %arg3[%c0_3, %c0_4], %2 {strides = array<i32>} : memref<16x128xf32, #tpu.memory_space<vmem>>, vector<16x128xf32>,
    %cst_5 = arith.constant dense<0.000000e+00> : vector<128xf32>
    %4 = vector.multi_reduction <add>, %2, %cst_5 [0] : vector<16x128xf32> to vector<128xf32>
    %5 = vector.shape_cast %4 : vector<128xf32> to vector<1x128xf32>
    %c0_6 = arith.constant 0 : index
    %c0_7 = arith.constant 0 : index
    %c0_8 = arith.constant 0 : index
    %6 = vector.load %arg4[%c0_6, %c0_7, %c0_8] : memref<1x2x128xf32, #tpu.memory_space<vmem>>, vector<1x1x128xf32>
    %7 = vector.shape_cast %6 : vector<1x1x128xf32> to vector<1x128xf32>
    %8 = vector.shape_cast %5 : vector<1x128xf32> to vector<1x1x128xf32>
    tpu.vector_store %arg4[%c0_6, %c0_7, %c0_8], %8 {strides = array<i32>} : memref<1x2x128xf32, #tpu.memory_space<vmem>>, vector<1x1x128xf32>,
    %9 = arith.mulf %2, %2 : vector<16x128xf32>
    %cst_9 = arith.constant dense<0.000000e+00> : vector<128xf32>
    %10 = vector.multi_reduction <add>, %9, %cst_9 [0] : vector<16x128xf32> to vector<128xf32>
    %11 = vector.shape_cast %10 : vector<128xf32> to vector<1x128xf32>
    %c0_10 = arith.constant 0 : index
    %c1 = arith.constant 1 : index
    %c0_11 = arith.constant 0 : index
    %12 = vector.load %arg4[%c0_10, %c1, %c0_11] : memref<1x2x128xf32, #tpu.memory_space<vmem>>, vector<1x1x128xf32>
    %13 = vector.shape_cast %12 : vector<1x1x128xf32> to vector<1x128xf32>
    %14 = vector.shape_cast %11 : vector<1x128xf32> to vector<1x1x128xf32>
    tpu.vector_store %arg4[%c0_10, %c1, %c0_11], %14 {strides = array<i32>} : memref<1x2x128xf32, #tpu.memory_space<vmem>>, vector<1x1x128xf32>,
    return
  }
  func.func @transform_0(%arg0: i32) -> (i32, i32) {
    %c0_i32 = arith.constant 0 : i32
    %c0_i32_0 = arith.constant 0 : i32
    return %arg0, %c0_i32 : i32, i32
  }
  func.func @transform_1(%arg0: i32) -> (i32, i32) {
    %c0_i32 = arith.constant 0 : i32
    %c0_i32_0 = arith.constant 0 : i32
    %c0_i32_1 = arith.constant 0 : i32
    return %c0_i32, %c0_i32_0 : i32, i32
  }
  func.func @transform_2(%arg0: i32) -> (i32, i32) {
    %c0_i32 = arith.constant 0 : i32
    %c0_i32_0 = arith.constant 0 : i32
    return %arg0, %c0_i32 : i32, i32
  }
  func.func @transform_3(%arg0: i32) -> (i32, i32, i32) {
    %c0_i32 = arith.constant 0 : i32
    %c0_i32_0 = arith.constant 0 : i32
    %c0_i32_1 = arith.constant 0 : i32
    return %arg0, %c0_i32, %c0_i32_0 : i32, i32, i32
  }
}

module attributes {stable_mosaic.version = 11 : i64} {
  func.func @bn_elu_kernel(%arg0: i32, %arg1: memref<16x128xf32, #tpu.memory_space<vmem>>, %arg2: memref<1x128xf32, #tpu.memory_space<vmem>>, %arg3: memref<1x128xf32, #tpu.memory_space<vmem>>, %arg4: memref<16x128xf32, #tpu.memory_space<vmem>>) attributes {dimension_semantics = [#tpu.dimension_semantics<parallel>], iteration_bounds = array<i64: 1>, scalar_prefetch = 0 : i64, scratch_operands = 0 : i64, tpu.core_type = #tpu.core_type<tc>, window_params = [{transform_indices = @transform_0, window_bounds = array<i64: 16, 128>}, {pipeline_mode = #tpu.pipeline_mode<synchronous>, transform_indices = @transform_1, window_bounds = array<i64: 1, 128>}, {pipeline_mode = #tpu.pipeline_mode<synchronous>, transform_indices = @transform_2, window_bounds = array<i64: 1, 128>}, {transform_indices = @transform_3, window_bounds = array<i64: 16, 128>}]} {
    %c0 = arith.constant 0 : index
    %c0_0 = arith.constant 0 : index
    %0 = vector.load %arg1[%c0, %c0_0] : memref<16x128xf32, #tpu.memory_space<vmem>>, vector<16x128xf32>
    %c0_1 = arith.constant 0 : index
    %c0_2 = arith.constant 0 : index
    %1 = vector.load %arg2[%c0_1, %c0_2] : memref<1x128xf32, #tpu.memory_space<vmem>>, vector<1x128xf32>
    %2 = vector.broadcast %1 : vector<1x128xf32> to vector<16x128xf32>
    %3 = arith.mulf %0, %2 : vector<16x128xf32>
    %c0_3 = arith.constant 0 : index
    %c0_4 = arith.constant 0 : index
    %4 = vector.load %arg3[%c0_3, %c0_4] : memref<1x128xf32, #tpu.memory_space<vmem>>, vector<1x128xf32>
    %5 = vector.broadcast %4 : vector<1x128xf32> to vector<16x128xf32>
    %6 = arith.addf %3, %5 : vector<16x128xf32>
    %cst = arith.constant 0.000000e+00 : f32
    %7 = vector.broadcast %cst : f32 to vector<16x128xf32>
    %8 = arith.cmpf ogt, %6, %7 : vector<16x128xf32>
    %cst_5 = arith.constant 0.000000e+00 : f32
    %9 = vector.broadcast %cst_5 : f32 to vector<16x128xf32>
    %10 = arith.minimumf %6, %9 : vector<16x128xf32>
    %11 = math.exp %10 : vector<16x128xf32>
    %cst_6 = arith.constant 1.000000e+00 : f32
    %12 = vector.broadcast %cst_6 : f32 to vector<16x128xf32>
    %13 = arith.subf %11, %12 : vector<16x128xf32>
    %14 = arith.select %8, %6, %13 : vector<16x128xi1>, vector<16x128xf32>
    %c0_7 = arith.constant 0 : index
    %c0_8 = arith.constant 0 : index
    %15 = vector.load %arg4[%c0_7, %c0_8] : memref<16x128xf32, #tpu.memory_space<vmem>>, vector<16x128xf32>
    tpu.vector_store %arg4[%c0_7, %c0_8], %14 {strides = array<i32>} : memref<16x128xf32, #tpu.memory_space<vmem>>, vector<16x128xf32>,
    return
  }
  func.func @transform_0(%arg0: i32) -> (i32, i32) {
    %c0_i32 = arith.constant 0 : i32
    %c0_i32_0 = arith.constant 0 : i32
    return %arg0, %c0_i32 : i32, i32
  }
  func.func @transform_1(%arg0: i32) -> (i32, i32) {
    %c0_i32 = arith.constant 0 : i32
    %c0_i32_0 = arith.constant 0 : i32
    %c0_i32_1 = arith.constant 0 : i32
    return %c0_i32, %c0_i32_0 : i32, i32
  }
  func.func @transform_2(%arg0: i32) -> (i32, i32) {
    %c0_i32 = arith.constant 0 : i32
    %c0_i32_0 = arith.constant 0 : i32
    %c0_i32_1 = arith.constant 0 : i32
    return %c0_i32, %c0_i32_0 : i32, i32
  }
  func.func @transform_3(%arg0: i32) -> (i32, i32) {
    %c0_i32 = arith.constant 0 : i32
    %c0_i32_0 = arith.constant 0 : i32
    return %arg0, %c0_i32 : i32, i32
  }
}

</mosaic_0001>

<bundles_post_ra>
// kernel: conv_layer_forward.3
= control target key start
LH: loop header
LB: loop body
LE: loop exit
PB: predicated region body
PF: predicated region fallthrough
CT: control target
= control target key end

     0   :  { %s92_s0 = inlined_call_operand.vmem [shape: f32[16,128], index: 0, kind: input, shape index: {}]   ;;  %s93_s1 = inlined_call_operand.vmem [shape: f32[1,128], index: 1, kind: input, shape index: {}]   ;;  %s94_s2 = inlined_call_operand.vmem [shape: f32[1,128], index: 2, kind: input, shape index: {}]   ;;  %s95_s3 = inlined_call_operand.vmem [shape: f32[16,128], index: 3, kind: output, shape index: {}]  }
   0x1   :  { %v14_v0 = vld [vmem:[%s92_s0] sm:$0xff]  ;;  %v15_v3 = vld [vmem:[%s92_s0 + $0x8] sm:$0xff] }
   0x2   :  { %v48_v1 = vld [vmem:[%s93_s1] ss:$0 sm:$0xff] }
   0x3   :  { %v49_v2 = vld [vmem:[%s94_s2] ss:$0 sm:$0xff]  ;;  %v20_v4 = vmul.f32 %v48_v1, %v14_v0  ;;  %v21_v5 = vmul.f32 %v48_v1, %v15_v3 }
   0x5   :  { %v26_v6 = vadd.f32 %v49_v2, %v20_v4  ;;  %v27_v7 = vadd.f32 %v49_v2, %v21_v5 }
   0x7   :  { %v30_v8 = vmin.f32 %v26_v6, 0.0  ;;  %v31_v9 = vmin.f32 %v27_v7, 0.0  ;;  %vm28_vm0 = vcmp.gt.f32.partialorder %v26_v6, 0.0  ;;  %vm29_vm1 = vcmp.gt.f32.partialorder %v27_v7, 0.0 }
   0x9   :  { %v32_v10 = vmul.f32 1.442695, %v30_v8  ;;  %v34_v11 = vmul.f32 1.442695, %v31_v9 }
   0xb   :  { %50 = vpow2.f32 %v32_v10 }
   0xc   :  { %52 = vpow2.f32 %v34_v11 }
  0x11   :  { %v51_v12 = vpop.eup %50 }
  0x12   :  { %v53_v13 = vpop.eup %52  ;;  %v46_v14 = vadd.f32 -1.0, %v51_v12 }
  0x13   :  { %v47_v15 = vadd.f32 -1.0, %v53_v13 }
  0x14   :  { %v38_v16 = vsel %vm28_vm0, %v26_v6, %v46_v14 }
  0x15   :  { %40 = vst [vmem:[%s95_s3] sm:$0xff] %v38_v16  ;;  %v39_v17 = vsel %vm29_vm1, %v27_v7, %v47_v15 }
  0x16   :  { %41 = vst [vmem:[%s95_s3 + $0x8] sm:$0xff] %v39_v17 }

// kernel: conv_layer_forward.2
= control target key start
LH: loop header
LB: loop body
LE: loop exit
PB: predicated region body
PF: predicated region fallthrough
CT: control target
= control target key end

     0   :  { %s231_s1 = inlined_call_operand.vmem [shape: bf16[128,128], index: 1, kind: input, shape index: {}]   ;;  %s232_s0 = inlined_call_operand.vmem [shape: bf16[16,128], index: 0, kind: input, shape index: {}]   ;;  %s233_s2 = inlined_call_operand.vmem [shape: f32[16,128], index: 2, kind: output, shape index: {0}]   ;;  %s234_s3 = inlined_call_operand.vmem [shape: f32[1,2,128], index: 3, kind: output, shape index: {1}]  }
   0x1   :  { %v171_v0 = vld [vmem:[%s231_s1 + $0x38] sm:$0xff]  ;;  %v170_v1 = vld [vmem:[%s231_s1 + $0x30] sm:$0xff]  ;;  %v169_v2 = vld [vmem:[%s231_s1 + $0x28] sm:$0xff] }
   0x2   :  { %85 = vmatpush.bf16.msra.mxu0 %v171_v0  ;;  %v168_v3 = vld [vmem:[%s231_s1 + $0x20] sm:$0xff]  ;;  %v167_v4 = vld [vmem:[%s231_s1 + $0x18] sm:$0xff]  ;;  %v166_v5 = vld [vmem:[%s231_s1 + $0x10] sm:$0xff] }
   0x3   :  { %v165_v6 = vld [vmem:[%s231_s1 + $0x8] sm:$0xff]  ;;  %v164_v7 = vld [vmem:[%s231_s1] sm:$0xff] }
   0x4   :  { %v163_v8 = vld [vmem:[%s232_s0] sm:$0xff] }
   0x6   :  { %86 = vmatpush.bf16.msra.mxu0 %v170_v1 }
   0xa   :  { %87 = vmatpush.bf16.msra.mxu0 %v169_v2 }
   0xe   :  { %88 = vmatpush.bf16.msra.mxu0 %v168_v3 }
  0x12   :  { %89 = vmatpush.bf16.msra.mxu0 %v167_v4 }
  0x16   :  { %90 = vmatpush.bf16.msra.mxu0 %v166_v5 }
  0x1a   :  { %91 = vmatpush.bf16.msra.mxu0 %v165_v6 }
  0x1e   :  { %92 = vmatpush.bf16.msra.mxu0 %v164_v7 }
  0x21   :  { %93 = vmatmul.bf16.vlgmr.msra.gmra.mxu0 %v163_v8 }
  0x9e   :  { %v94_v9 = vpop.f32.mrf.mxu0 }
  0x9f   :  { %99 = vst [vmem:[%s233_s2] sm:$0xff] %v94_v9  ;;  %v109_v11 = vmul.f32 %v94_v9, %v94_v9 }
  0xa6   :  { %v96_v10 = vpop.f32.mrf.mxu0 }
  0xa7   :  { %100 = vst [vmem:[%s233_s2 + $0x8] sm:$0xff] %v96_v10  ;;  %v101_v12 = vadd.f32 %v96_v10, %v94_v9  ;;  %v110_v13 = vmul.f32 %v96_v10, %v96_v10 }
  0xa9   :  { %v102_v14 = vrot.slane %v101_v12, 4  ;;  %v111_v15 = vadd.f32 %v110_v13, %v109_v11 }
  0xab   :  { %v103_v16 = vadd.f32 %v102_v14, %v101_v12  ;;  %v112_v17 = vrot.slane %v111_v15, 4 }
  0xad   :  { %v104_v18 = vrot.slane %v103_v16, 2  ;;  %v113_v19 = vadd.f32 %v112_v17, %v111_v15 }
  0xaf   :  { %v105_v20 = vadd.f32 %v104_v18, %v103_v16  ;;  %v114_v21 = vrot.slane %v113_v19, 2 }
  0xb1   :  { %v106_v22 = vrot.slane %v105_v20, 1  ;;  %v115_v23 = vadd.f32 %v114_v21, %v113_v19 }
  0xb3   :  { %v107_v24 = vadd.f32 %v106_v22, %v105_v20  ;;  %v116_v25 = vrot.slane %v115_v23, 1 }
  0xb5   :  { %108 = vst [vmem:[%s234_s3] sm:$0x1] %v107_v24  ;;  %v117_v26 = vadd.f32 %v116_v25, %v115_v23 }
  0xb7   :  { %118 = vst [vmem:[%s234_s3 + $0x1] sm:$0x1] %v117_v26 }

</bundles_post_ra>
